<compile_context>
chip_gen: v6e
topology: v6e:2x2x1
jax: 0.10.0
libtpu: 0.0.40
codegen_flags: <defaults>
</compile_context>

<pallas_src>
import jax
import jax.numpy as jnp
from jax.experimental import pallas as pl
from jax.experimental.pallas import tpu as pltpu


def _round_up(x, m):
    return (x + m - 1) // m * m


def _vmem_capacity_bytes():
    """Physical VMEM of the current TPU generation (conservative fallback)."""
    try:
        cap = int(pltpu.get_tpu_info().vmem_capacity_bytes)
        if cap > 0:
            return cap
    except Exception:
        pass
    return 64 * 1024 * 1024  # v7x-sized fallback: safe on every generation


def _make_kernel(hw, thw, ragged):
    """Build the kernel with HW / tile-width baked in (for tail masking)."""

    def ca_kernel(x_ref, w_ref, b_ref, o_ref, acc_ref):
        # x_ref  : (tn, C_in, thw)   spatial tile of tn batch items
        # w_ref  : (C_in, C_out) f32 pre-transposed weight, pre-scaled by 1/(H*W)
        # b_ref  : (1, C_out)   f32  bias
        # o_ref  : (tn, C_out)       sigmoid(conv1x1(global_avg_pool(x)))
        # acc_ref: (tn, C_in)   f32  running spatial sum
        k = pl.program_id(1)

        @pl.when(k == 0)
        def _init():
            acc_ref[...] = jnp.zeros_like(acc_ref)

        xv = x_ref[...].astype(jnp.float32)
        if ragged:
            # The last spatial block reads past HW; those lanes hold
            # unspecified data and must not contaminate the sum.
            lane = jax.lax.broadcasted_iota(jnp.int32, xv.shape, 2)
            valid = hw - k * thw            # >= thw on all but the last block
            xv = jnp.where(lane < valid, xv, 0.0)
        acc_ref[...] += jnp.sum(xv, axis=-1)

        @pl.when(k == pl.num_programs(1) - 1)
        def _finalize():
            # Mean scale 1/(H*W) is already folded into w_ref (kept in f32).
            y = jnp.dot(acc_ref[...], w_ref[...],
                        preferred_element_type=jnp.float32)
            y = y + b_ref[...]
            o_ref[...] = jax.nn.sigmoid(y).astype(o_ref.dtype)

    return ca_kernel


def ca_module_forward(x, weight, bias, *, x_buffer_bytes=None, max_thw=None):
    """x: (N, C_in, H, W); weight: (C_out, C_in, 1, 1); bias: (C_out,).

    Returns (N, C_out, 1, 1), matching PyTorch CAModule2.forward.
    """
    N, C_in, H, W = x.shape
    C_out = weight.shape[0]
    HW = H * W

    itemsize = jnp.dtype(x.dtype).itemsize
    sublane = {4: 8, 2: 16, 1: 32}.get(itemsize, 8)
    cin_p = _round_up(C_in, sublane)      # sublane-padded C_in (VMEM footprint)
    hw_p = _round_up(HW, 128)             # lane-padded spatial extent

    # ---- generation-aware tile budget --------------------------------------
    cap = _vmem_capacity_bytes()
    if x_buffer_bytes is None:
        # ~1/8 of physical VMEM per x buffer: 16 MiB on v5e/v6e, 8 MiB on v7x.
        x_buffer_bytes = max(2 * 1024 * 1024, min(16 * 1024 * 1024, cap // 8))

    # ---- tiling decisions ---------------------------------------------------
    tn = N if N < 8 else 8                              # batch rows per step

    # largest multiple-of-128 spatial tile inside the byte budget
    thw = max(128, (x_buffer_bytes // max(1, tn * cin_p * itemsize)) // 128 * 128)
    if max_thw is not None:
        thw = min(thw, _round_up(max_thw, 128))

    if thw >= hw_p:
        # Whole spatial extent in one block: no ragged tail, no mask.
        thw = HW
        if N > 8:
            # Spend the spare budget widening the batch tile (multiple of 8).
            tn_fit = x_buffer_bytes // max(1, cin_p * hw_p * itemsize)
            tn = min(_round_up(N, 8), max(8, (tn_fit // 8) * 8))
    ragged = (thw < HW) and (HW % thw != 0)

    # ---- wrapper-side layout plumbing (done once, all copies are tiny) ------
    x3d = x.reshape(N, C_in, HW)                        # contiguous -> free
    # (C_in, C_out) weight in f32 with the 1/(H*W) mean scale folded in.
    w = weight.reshape(C_out, C_in).T.astype(jnp.float32) * (1.0 / float(HW))
    b2d = bias.reshape(1, C_out).astype(jnp.float32)

    # ---- VMEM limit sized to the actual double-buffered footprint -----------
    x_block_vmem = tn * cin_p * _round_up(thw, 128) * itemsize
    f32_temp = 0 if x.dtype == jnp.float32 else tn * cin_p * _round_up(thw, 128) * 4
    vmem_need = 2 * x_block_vmem + f32_temp + (4 << 20)
    vmem_limit = int(min(max(16 << 20, vmem_need), cap * 3 // 4))

    grid = (pl.cdiv(N, tn), pl.cdiv(HW, thw))

    out = pl.pallas_call(
        _make_kernel(HW, thw, ragged),
        out_shape=jax.ShapeDtypeStruct((N, C_out), x.dtype),
        grid_spec=pltpu.PrefetchScalarGridSpec(
            num_scalar_prefetch=0,
            grid=grid,
            in_specs=[
                pl.BlockSpec((tn, C_in, thw), lambda n, k: (n, 0, k)),
                pl.BlockSpec((C_in, C_out), lambda n, k: (0, 0)),
                pl.BlockSpec((1, C_out), lambda n, k: (0, 0)),
            ],
            out_specs=pl.BlockSpec((tn, C_out), lambda n, k: (n, 0)),
            scratch_shapes=[pltpu.VMEM((tn, C_in), jnp.float32)],
        ),
        compiler_params=pltpu.CompilerParams(
            # batch axis independent (megacore-shardable); HW axis is a reduction.
            dimension_semantics=("parallel", "arbitrary"),
            vmem_limit_bytes=vmem_limit,
        ),
    )(x3d, w, b2d)

    return out.reshape(N, C_out, 1, 1)


if __name__ == "__main__":
    key = jax.random.PRNGKey(0)
    k1, k2, k3, k4, k5, k6 = jax.random.split(key, 6)

    def reference(x, weight, bias):
        C_out, C_in = weight.shape[0], weight.shape[1]
        pooled = jnp.mean(x, axis=(2, 3))                       # (N, C_in)
        y = pooled @ weight.reshape(C_out, C_in).T + bias[None, :]
        return jax.nn.sigmoid(y).reshape(x.shape[0], C_out, 1, 1)

    # Case 1: small aligned shape — single spatial block, single batch block.
    N, C_in, C_out, H, W = 2, 4, 4, 16, 16
    x = jax.random.normal(k1, (N, C_in, H, W), dtype=jnp.float32)
    weight = jax.random.normal(k2, (C_out, C_in, 1, 1), dtype=jnp.float32) * 0.1
    bias = jax.random.normal(k3, (C_out,), dtype=jnp.float32) * 0.1

    out = jax.block_until_ready(ca_module_forward(x, weight, bias))
    assert out.shape == (N, C_out, 1, 1)
    ref = reference(x, weight, bias)
    assert jnp.allclose(out, ref, atol=1e-5, rtol=1e-5), "case 1 mismatch"

    # Case 2: non-aligned spatial size + N not a multiple of tn, with a forced
    # small spatial tile to exercise the multi-step reduction, the in-kernel
    # ragged-tail mask, and the clipped boundary output block (no jnp.pad).
    N2, C_in2, C_out2, H2, W2 = 10, 4, 6, 20, 19
    x2 = jax.random.normal(k4, (N2, C_in2, H2, W2), dtype=jnp.float32)
    w2 = jax.random.normal(k5, (C_out2, C_in2, 1, 1), dtype=jnp.float32) * 0.1
    b2 = jax.random.normal(k6, (C_out2,), dtype=jnp.float32) * 0.1

    out2 = jax.block_until_ready(ca_module_forward(x2, w2, b2, max_thw=128))
    assert out2.shape == (N2, C_out2, 1, 1)
    ref2 = reference(x2, w2, b2)
    assert jnp.allclose(out2, ref2, atol=1e-5, rtol=1e-5), "case 2 mismatch"

    print("KERNEL_OK")
</pallas_src>

<mosaic_0001>
module attributes {stable_mosaic.version = 11 : i64} {
  func.func @ca_kernel(%arg0: i32, %arg1: i32, %arg2: memref<2x4x256xf32, #tpu.memory_space<vmem>>, %arg3: memref<4x4xf32, #tpu.memory_space<vmem>>, %arg4: memref<1x4xf32, #tpu.memory_space<vmem>>, %arg5: memref<2x4xf32, #tpu.memory_space<vmem>>, %arg6: memref<2x4xf32, #tpu.memory_space<vmem>>) attributes {dimension_semantics = [#tpu.dimension_semantics<parallel>, #tpu.dimension_semantics<arbitrary>], iteration_bounds = array<i64: 1, 1>, scalar_prefetch = 0 : i64, scratch_operands = 1 : i64, tpu.core_type = #tpu.core_type<tc>, window_params = [{transform_indices = @transform_0, window_bounds = array<i64: 2, 4, 256>}, {pipeline_mode = #tpu.pipeline_mode<synchronous>, transform_indices = @transform_1, window_bounds = array<i64: 4, 4>}, {pipeline_mode = #tpu.pipeline_mode<synchronous>, transform_indices = @transform_2, window_bounds = array<i64: 1, 4>}, {transform_indices = @transform_3, window_bounds = array<i64: 2, 4>}]} {
    %c0_i32 = arith.constant 0 : i32
    %0 = arith.cmpi eq, %arg1, %c0_i32 : i32
    %1 = arith.extui %0 : i1 to i32
    %c0_i32_0 = arith.constant 0 : i32
    %2 = arith.cmpi ne, %1, %c0_i32_0 : i32
    scf.if %2 {
      %cst_9 = arith.constant 0.000000e+00 : f32
      %11 = vector.broadcast %cst_9 : f32 to vector<2x4xf32>
      %c0_10 = arith.constant 0 : index
      %c0_11 = arith.constant 0 : index
      %12 = vector.load %arg6[%c0_10, %c0_11] : memref<2x4xf32, #tpu.memory_space<vmem>>, vector<2x4xf32>
      tpu.vector_store %arg6[%c0_10, %c0_11], %11 {strides = array<i32>} : memref<2x4xf32, #tpu.memory_space<vmem>>, vector<2x4xf32>,
    } else {
    }
    %c0 = arith.constant 0 : index
    %c0_1 = arith.constant 0 : index
    %c0_2 = arith.constant 0 : index
    %3 = vector.load %arg2[%c0, %c0_1, %c0_2] : memref<2x4x256xf32, #tpu.memory_space<vmem>>, vector<2x4x256xf32>
    %c0_3 = arith.constant 0 : index
    %c0_4 = arith.constant 0 : index
    %4 = vector.load %arg6[%c0_3, %c0_4] : memref<2x4xf32, #tpu.memory_space<vmem>>, vector<2x4xf32>
    %cst = arith.constant dense<0.000000e+00> : vector<2x4xf32>
    %5 = vector.multi_reduction <add>, %3, %cst [2] : vector<2x4x256xf32> to vector<2x4xf32>
    %6 = arith.addf %4, %5 : vector<2x4xf32>
    %c0_5 = arith.constant 0 : index
    %c0_6 = arith.constant 0 : index
    %7 = vector.load %arg6[%c0_5, %c0_6] : memref<2x4xf32, #tpu.memory_space<vmem>>, vector<2x4xf32>
    tpu.vector_store %arg6[%c0_5, %c0_6], %6 {strides = array<i32>} : memref<2x4xf32, #tpu.memory_space<vmem>>, vector<2x4xf32>,
    %c0_i32_7 = arith.constant 0 : i32
    %8 = arith.cmpi eq, %arg1, %c0_i32_7 : i32
    %9 = arith.extui %8 : i1 to i32
    %c0_i32_8 = arith.constant 0 : i32
    %10 = arith.cmpi ne, %9, %c0_i32_8 : i32
    scf.if %10 {
      %c0_9 = arith.constant 0 : index
      %c0_10 = arith.constant 0 : index
      %11 = vector.load %arg6[%c0_9, %c0_10] : memref<2x4xf32, #tpu.memory_space<vmem>>, vector<2x4xf32>
      %c0_11 = arith.constant 0 : index
      %c0_12 = arith.constant 0 : index
      %12 = vector.load %arg3[%c0_11, %c0_12] : memref<4x4xf32, #tpu.memory_space<vmem>>, vector<4x4xf32>
      %cst_13 = arith.constant dense<0.000000e+00> : vector<2x4xf32>
      %13 = tpu.matmul %11, %12, %cst_13 {dimension_numbers = #tpu.dot_dimension_numbers<[1], [0], [0], [1], [0, 0, 1, 1], [], []>} : vector<2x4xf32>, vector<4x4xf32>, vector<2x4xf32> -> vector<2x4xf32>
      %c0_14 = arith.constant 0 : index
      %c0_15 = arith.constant 0 : index
      %14 = vector.load %arg4[%c0_14, %c0_15] : memref<1x4xf32, #tpu.memory_space<vmem>>, vector<1x4xf32>
      %15 = vector.broadcast %14 : vector<1x4xf32> to vector<2x4xf32>
      %16 = arith.addf %13, %15 : vector<2x4xf32>
      %17 = arith.negf %16 : vector<2x4xf32>
      %18 = math.exp %17 : vector<2x4xf32>
      %cst_16 = arith.constant 1.000000e+00 : f32
      %19 = vector.broadcast %cst_16 : f32 to vector<2x4xf32>
      %20 = arith.addf %19, %18 : vector<2x4xf32>
      %21 = arith.divf %19, %20 : vector<2x4xf32>
      %c0_17 = arith.constant 0 : index
      %c0_18 = arith.constant 0 : index
      %22 = vector.load %arg5[%c0_17, %c0_18] : memref<2x4xf32, #tpu.memory_space<vmem>>, vector<2x4xf32>
      tpu.vector_store %arg5[%c0_17, %c0_18], %21 {strides = array<i32>} : memref<2x4xf32, #tpu.memory_space<vmem>>, vector<2x4xf32>,
    } else {
    }
    return
  }
  func.func @transform_0(%arg0: i32, %arg1: i32) -> (i32, i32, i32) {
    %c0_i32 = arith.constant 0 : i32
    %c0_i32_0 = arith.constant 0 : i32
    return %arg0, %c0_i32, %arg1 : i32, i32, i32
  }
  func.func @transform_1(%arg0: i32, %arg1: i32) -> (i32, i32) {
    %c0_i32 = arith.constant 0 : i32
    %c0_i32_0 = arith.constant 0 : i32
    %c0_i32_1 = arith.constant 0 : i32
    return %c0_i32, %c0_i32_0 : i32, i32
  }
  func.func @transform_2(%arg0: i32, %arg1: i32) -> (i32, i32) {
    %c0_i32 = arith.constant 0 : i32
    %c0_i32_0 = arith.constant 0 : i32
    %c0_i32_1 = arith.constant 0 : i32
    return %c0_i32, %c0_i32_0 : i32, i32
  }
  func.func @transform_3(%arg0: i32, %arg1: i32) -> (i32, i32) {
    %c0_i32 = arith.constant 0 : i32
    %c0_i32_0 = arith.constant 0 : i32
    return %arg0, %c0_i32 : i32, i32
  }
}

</mosaic_0001>

<bundles_post_ra>
// kernel: tpu_custom_call.1
= control target key start
LH: loop header
LB: loop body
LE: loop exit
PB: predicated region body
PF: predicated region fallthrough
CT: control target
= control target key end

     0   :  { %8 = vsyncpa [#allocation4], 0  ;;  %s334_s0 = inlined_call_operand.hbm [shape: f32[2,4,256], index: 0, kind: input, shape index: {}]   ;;  %s335_s1 = inlined_call_operand.hbm [shape: f32[4,4], index: 1, kind: input, shape index: {}]   ;;  %s336_s2 = inlined_call_operand.vmem [shape: f32[1,4], index: 2, kind: input, shape index: {}]   ;;  %s337_s3 = inlined_call_operand.hbm [shape: f32[2,4], index: 3, kind: output, shape index: {}]  }
   0x1   :  { %9 = vsyncpa [#allocation7], 0 }
   0x2   :  { %10 = vsyncpa [#allocation5], 0  ;;  %s287_s12 = smov [#allocation3]  }
   0x3   :  { %s16_s13 = sshll.u32 %s287_s12, 4  ;;  %s17_s13 = int_to_ptr.vmem [resolvable:$true] %s16_s13 }
   0x4   :  { %s229_s14 = scalar_lea.vmem %s17_s13, 256  ;;  %p234_p1 = scmp.lt.s32.totalorder %s17_s13, %s17_s13 }
   0x5   :  { %p230_p0 = scmp.ne.s32.totalorder %s17_s13, %s229_s14  ;;  %p235_p2 = scmp.lt.s32.totalorder %s229_s14, %s229_s14 }
   0x7   :  { %p236_p3 = por %p235_p2, %p234_p1 }
   0x9   :  { %p237_p4 = pnand %p236_p3, %p230_p0 }
   0xb   :  { %240 = shalt.err (!%p237_p4)
}
   0xc   :  { %s288_s15 = smov 128   ;;  %s289_s16 = smov 8  }
   0xd   :  { %22 = dma.hbm_to_vmem [thread:$0]  %s334_s0, 256, %s17_s13, [#allocation4], %s288_s15, %s288_s15, %s289_s16  }
   0xe   :  { %s290_s19 = smov [#allocation6]  }
   0xf   :  { %s29_s20 = sshll.u32 %s290_s19, 4  ;;  %s30_s20 = int_to_ptr.vmem [resolvable:$true] %s29_s20 }
  0x10   :  { %s249_s21 = scalar_lea.vmem %s30_s20, 64  ;;  %p254_p6 = scmp.lt.s32.totalorder %s30_s20, %s30_s20 }
  0x11   :  { %p250_p5 = scmp.ne.s32.totalorder %s30_s20, %s249_s21  ;;  %p255_p7 = scmp.lt.s32.totalorder %s249_s21, %s249_s21 }
  0x13   :  { %p256_p8 = por %p255_p7, %p254_p6 }
  0x15   :  { %p257_p9 = pnand %p256_p8, %p250_p5 }
  0x17   :  { %260 = shalt.err (!%p257_p9)
}
  0x18   :  { %32 = dma.hbm_to_vmem [thread:$0]  %s335_s1, 64, %s30_s20, [#allocation7]  }
  0x19   :  { %281 = dma.done.wait [#allocation4], 256  }
  0x1a   :  { %282 = vsyncadd [#allocation4], 4294967040 }
  0x1b   :  { %283 = dma.done.wait [#allocation7], 64  }
  0x1c   :  { %284 = vsyncadd [#allocation7], 4294967232  ;;  %vm56_vm0 = vcmask 1043456   ;;  %v47_v0 = vld [vmem:[#allocation3] sm:$0xff]  ;;  %v48_v1 = vld [vmem:[#allocation3 + $0x8] sm:$0xff]  ;;  %vm45_vm1 = vcmask 25600   ;;  %v69_v12 = vlaneseq }
  0x1d   :  { %v52_v2 = vcombine.high %v47_v0, %v47_v0  ;;  %v57_v3 = vsel %vm56_vm0, %v47_v0, 0.0  ;;  %v53_v4 = vcombine.high %v48_v1, %v48_v1  ;;  %v62_v6 = vsel %vm56_vm0, %v48_v1, 0.0  ;;  %v89_v11 = vld [vmem:[#allocation6] sm:$0xf]  ;;  %v197_v24 = vld [vmem:[%s336_s2] ss:$0 sm:$0xff] }
  0x1e   :  { %v291_v10 = vmov 0.0   ;;  %vm292_vm2 = vmmov 0   ;;  %v70_v13 = vand.u32 127, %v69_v12  ;;  %v72_v14 = vshrl.u32 %v69_v12, 7  ;;  %s293_s24 = smov [#allocation8]  }
  0x1f   :  { %v58_v5 = vsel %vm56_vm0, %v52_v2, 0.0  ;;  %v63_v7 = vsel %vm56_vm0, %v53_v4, 0.0  ;;  %46 = vst.msk [vmem:[#allocation2] sm:$0x3] %vm45_vm1, %v291_v10  ;;  %203 = vmatprep.subr.mxu0 %v291_v10  ;;  %205 = vmatprep.mubr.msk.f32.mxu0 %vm292_vm2, %v291_v10  ;;  %vm79_vm3 = vcmask 1041409   ;;  %vm97_vm4 = vcmask 31744  }
  0x20   :  { %v59_v8 = vadd.f32 %v58_v5, %v57_v3  ;;  %v64_v9 = vadd.f32 %v63_v7, %v62_v6  ;;  %204 = vmatpush3.msk.msra.mxu0 %vm56_vm0, %v89_v11  ;;  %v73_v16 = vsub.s32 %v70_v13, %v72_v14  ;;  %s187_s25 = sshll.u32 %s293_s24, 4  ;;  %s188_s25 = int_to_ptr.vmem [resolvable:$true] %s187_s25 }
  0x21   :  { %s261_s26 = scalar_lea.vmem %s188_s25, 32  ;;  %p266_p11 = scmp.lt.s32.totalorder %s188_s25, %s188_s25 }
  0x22   :  { %60 = vadd.xlane.f32.xlu0 %v59_v8  ;;  %p262_p10 = scmp.ne.s32.totalorder %s188_s25, %s261_s26  ;;  %p267_p12 = scmp.lt.s32.totalorder %s261_s26, %s261_s26 }
  0x24   :  { %p268_p13 = por %p267_p12, %p266_p11 }
  0x26   :  { %65 = vadd.xlane.f32.xlu0 %v64_v9  ;;  %v49_v20 = vld [vmem:[#allocation2] sm:$0x3]  ;;  %p269_p0 = pnand %p268_p13, %p262_p10 }
  0xab   :  { %v61_v15 = vpop.xlane.xlu0 %60 }
  0xac   :  { %v74_v18 = vrot.slane %v61_v15, %v73_v16 }
  0xaf   :  { %v66_v17 = vpop.xlane.xlu0 %65 }
  0xb0   :  { %v78_v19 = vrot.slane %v66_v17, %v73_v16 }
  0xb2   :  { %v80_v21 = vsel %vm79_vm3, %v78_v19, %v74_v18 }
  0xb3   :  { %v82_v22 = vadd.f32 %v80_v21, %v49_v20 }
  0xb5   :  { %84 = vst.msk [vmem:[#allocation2] sm:$0x3] %vm45_vm1, %v82_v22 }
  0xbc   :  { %v88_v23 = vld [vmem:[#allocation2] sm:$0x3] }
  0xbd   :  { %206 = vmatmul.mubr.msk.f32.vlgmr.msra.gmra.mxu0 %vm97_vm4, %v88_v23 }
 0x17d   :  { %v170_v25 = vpop.f32.mrf.mxu0 }
 0x17e   :  { %v171_v26 = vadd.f32 %v197_v24, %v170_v25 }
 0x17f   :  { %v207_v27 = vpop.f32.mrf.mxu0 }
 0x180   :  { %v200_v28 = vmul.f32 -1.442695, %v171_v26 }
 0x182   :  { %217 = vpow2.f32 %v200_v28 }
 0x18f   :  { %v218_v29 = vpop.eup %217 }
 0x190   :  { %v177_v30 = vadd.f32 1.0, %v218_v29 }
 0x192   :  { %219 = vrcp.f32 %v177_v30 }
 0x19f   :  { %v220_v31 = vpop.eup %219 }
 0x1a0   :  { %180 = vst.msk [vmem:[#allocation8] sm:$0x3] %vm45_vm1, %v220_v31 }
 0x1a1   :  { %272 = shalt.err (!%p269_p0)
}
 0x1a2   :  { %190 = dma.vmem_to_hbm [thread:$0]  %s188_s25, 32, %s337_s3, [#allocation5]  }
 0x1a3   :  { %285 = dma.done.wait [#allocation5], 32  }
 0x1a4   :  { %286 = vsyncadd [#allocation5], 4294967264 }
 0x1a5   :  { %194 = vsyncpa [#allocation4], 1 }
 0x1a6   :  { %195 = vsyncpa [#allocation7], 1 }
 0x1a7   :  { %196 = vsyncpa [#allocation5], 1 }

</bundles_post_ra>
